<compile_context>
chip_gen: v7x
topology: tpu7x:2x2x1
jax: 0.10.0
libtpu: 0.0.40
codegen_flags: <defaults>
</compile_context>

<pallas_src>
import jax
import jax.numpy as jnp
from jax.experimental import pallas as pl
from jax.experimental.pallas import tpu as pltpu


_ACTIVATIONS = {
    "relu": lambda x: jnp.maximum(x, 0.0),
    "tanh": jnp.tanh,
    "sigmoid": jax.nn.sigmoid,
    "leaky_relu": lambda x: jnp.where(x >= 0, x, 0.01 * x),  # PyTorch default slope
}
_TRANSCENDENTAL_ACTS = ("tanh", "sigmoid")


def _round_up(x, m):
    return ((x + m - 1) // m) * m


def _make_kernel(n_trunk, act, compute_dtype):
    """Fused MLP kernel.  Ref order: x, (W, b) * n_trunk, W_out, b_out, out.

    Matmul operands are cast to compute_dtype *inside* the kernel (in VMEM); the MXU
    accumulates in f32 and bias-add / activations stay f32 (safe on every TPU gen).
    Trunk linears are each followed by the activation; the fused output linear is not
    (matches both PyTorch modes).
    """

    def kernel(*refs):
        x_ref = refs[0]
        o_ref = refs[-1]
        h = x_ref[...]
        idx = 1
        for _ in range(n_trunk):
            w = refs[idx][...]
            b = refs[idx + 1][...]
            idx += 2
            h = jnp.dot(h.astype(compute_dtype), w,
                        preferred_element_type=jnp.float32) + b
            h = act(h)
        w = refs[idx][...]
        b = refs[idx + 1][...]
        y = jnp.dot(h.astype(compute_dtype), w,
                    preferred_element_type=jnp.float32) + b
        o_ref[...] = y.astype(o_ref.dtype)

    return kernel


def _init_linear(key, in_dim, out_dim):
    """Deterministic init mimicking nn.Linear's uniform(-1/sqrt(in), 1/sqrt(in))."""
    kw, kb = jax.random.split(key)
    scale = 1.0 / (in_dim ** 0.5)
    w = jax.random.uniform(kw, (in_dim, out_dim), jnp.float32, -scale, scale)
    b = jax.random.uniform(kb, (1, out_dim), jnp.float32, -scale, scale)
    return w, b


def _physical_vmem_bytes():
    try:
        return int(pltpu.get_tpu_info().vmem_capacity_bytes)
    except Exception:
        return 64 << 20  # conservative default = v7x per-TensorCore VMEM


class LatentClassifier:
    """JAX/Pallas re-implementation of the PyTorch LatentClassifier module."""

    def __init__(self, input_dim, num_classes, num_layers=1, hidden_dim=128,
                 activation="relu", key=None, compute_dtype=jnp.float32):
        if activation not in _ACTIVATIONS:
            raise ValueError(f"Unsupported activation: {activation}")
        if key is None:
            key = jax.random.PRNGKey(0)

        self.single_label_mode = isinstance(num_classes, int)
        self.num_classes = num_classes
        self.activation_name = activation
        self.act = _ACTIVATIONS[activation]
        self.compute_dtype = compute_dtype
        self._single_buffer_params = None  # probed on first call

        def next_key():
            nonlocal key
            key, sub = jax.random.split(key)
            return sub

        # Unified structure (matches both PyTorch modes): trunk = (num_layers - 1)
        # linears, each followed by the activation; output stage = one fused
        # (concatenated) linear with no activation.
        if num_layers == 1:
            trunk_dims = []
            out_in_dim = input_dim
        else:
            trunk_dims = ([(input_dim, hidden_dim)]
                          + [(hidden_dim, hidden_dim)] * (num_layers - 2))
            out_in_dim = hidden_dim

        self._trunk_f32 = [_init_linear(next_key(), di, do) for di, do in trunk_dims]

        if self.single_label_mode:
            self.head_labels = None
            self.head_sizes = [num_classes]
        else:
            self.head_labels = list(num_classes.keys())
            self.head_sizes = [num_classes[l] for l in self.head_labels]

        heads = [_init_linear(next_key(), out_in_dim, nc) for nc in self.head_sizes]
        W_out = jnp.concatenate([w for w, _ in heads], axis=1)
        b_out = jnp.concatenate([b for _, b in heads], axis=1)
        self._W_out_f32 = W_out            # unpadded, for the pure-JAX reference
        self._b_out_f32 = b_out
        self.total_out = W_out.shape[1]

        # Pad fused output width to a multiple of 128 -> lane-dense (unmasked) stores.
        total_pad = _round_up(self.total_out, 128)
        if total_pad != self.total_out:
            W_out = jnp.pad(W_out, ((0, 0), (0, total_pad - self.total_out)))
            b_out = jnp.pad(b_out, ((0, 0), (0, total_pad - self.total_out)))
        self.total_out_padded = total_pad

        # Kernel-side parameter copies: matmul operands in compute_dtype, biases f32.
        self._trunk_k = [(w.astype(compute_dtype), b) for (w, b) in self._trunk_f32]
        self._W_out_k = W_out.astype(compute_dtype)
        self._b_out_k = b_out

        self._layer_dims = ([tuple(w.shape) for w, _ in self._trunk_k]
                            + [tuple(self._W_out_k.shape)])

    # ---------------------------------------------------------------- tiling
    def _pick_batch_tile(self, B, x_itemsize):
        c_itemsize = jnp.dtype(self.compute_dtype).itemsize
        # Packed-sublane alignment of the narrowest dtype touching the batch dim
        # (8 rows f32, 16 rows bf16, 32 rows int8/fp8) -> avoids packed relayouts.
        align = max(8, 32 // min(x_itemsize, c_itemsize))
        cap = 1024                       # per-step overhead is amortized well past 512
        n_tiles = -(-B // cap)
        if n_tiles < 2 and B >= 2 * align:
            n_tiles = 2                  # >= 2 grid steps -> both v7x TCs get work
        return _round_up(-(-B // n_tiles), align)

    # --------------------------------------------------------------- forward
    def _forward(self, x, single_buffer_params):
        B, D = x.shape
        n_trunk = len(self._trunk_k)
        total_pad = self.total_out_padded
        out_dtype = x.dtype              # write back in the caller's dtype
        x_isz = jnp.dtype(x.dtype).itemsize
        c_isz = jnp.dtype(self.compute_dtype).itemsize
        o_isz = jnp.dtype(out_dtype).itemsize

        TB = self._pick_batch_tile(B, x_isz)
        grid = (pl.cdiv(B, TB),)         # remainder-aware; Pallas masks the edge tile

        # Resident (constant-index) parameter blocks never change block index ->
        # single-buffer them to halve their VMEM footprint (v7x has only 64 MiB).
        pkw = {"pipeline_mode": pl.Buffered(1)} if single_buffer_params else {}

        args = [x]
        in_specs = [pl.BlockSpec((TB, D), lambda i: (i, 0))]
        for w, b in self._trunk_k:
            args += [w, b]
            in_specs += [pl.BlockSpec(w.shape, lambda i: (0, 0), **pkw),
                         pl.BlockSpec(b.shape, lambda i: (0, 0), **pkw)]
        args += [self._W_out_k, self._b_out_k]
        in_specs += [pl.BlockSpec(self._W_out_k.shape, lambda i: (0, 0), **pkw),
                     pl.BlockSpec(self._b_out_k.shape, lambda i: (0, 0), **pkw)]

        out_shape = jax.ShapeDtypeStruct((B, total_pad), out_dtype)
        out_spec = pl.BlockSpec((TB, total_pad), lambda i: (i, 0))

        # VMEM budget: double-buffered streamed tiles + resident params (x1 when
        # single-buffered) + in-kernel cast/activation temporaries + slack; capped
        # per generation (v7x: 64 MiB physical -> 48 MiB; v5e/v6e: 128 MiB -> 112 MiB).
        param_bytes = sum(w.size * c_isz + b.size * 4 for w, b in self._trunk_k)
        param_bytes += self._W_out_k.size * c_isz + self._b_out_k.size * 4
        stream_bytes = 2 * TB * D * x_isz + 2 * TB * total_pad * o_isz
        tmp_bytes = sum(TB * (do * 4 + di * c_isz) for di, do in self._layer_dims)
        vmem_bytes = (stream_bytes + (1 if single_buffer_params else 2) * param_bytes
                      + tmp_bytes + (4 << 20))
        phys = _physical_vmem_bytes()
        cap = (48 << 20) if phys <= (64 << 20) else (112 << 20)
        vmem_bytes = int(min(max(vmem_bytes, 16 << 20), cap))

        # Advisory cost estimate: lets XLA schedule surrounding ops around the call.
        flops = 2 * B * sum(di * do for di, do in self._layer_dims)
        trans = (B * sum(do for _, do in self._layer_dims[:-1])
                 if self.activation_name in _TRANSCENDENTAL_ACTS else 0)
        bytes_accessed = B * D * x_isz + param_bytes + B * total_pad * o_isz

        kernel = _make_kernel(n_trunk, self.act, self.compute_dtype)

        return pl.pallas_call(
            kernel,
            out_shape=out_shape,
            grid_spec=pltpu.PrefetchScalarGridSpec(
                num_scalar_prefetch=0,
                grid=grid,
                in_specs=in_specs,
                out_specs=out_spec,
            ),
            compiler_params=pltpu.CompilerParams(
                dimension_semantics=("parallel",),   # batch tiles -> both TCs on v7x
                vmem_limit_bytes=vmem_bytes,
            ),
            cost_estimate=pl.CostEstimate(
                flops=int(flops),
                transcendentals=int(trans),
                bytes_accessed=int(bytes_accessed)),
        )(*args)

    def __call__(self, x):
        if self._single_buffer_params is None:
            # Probe single-buffered resident params once; fall back if this jax build
            # rejects pipeline_mode=pl.Buffered(1) on constant-index blocks.
            try:
                out = jax.block_until_ready(self._forward(x, True))
                self._single_buffer_params = True
            except Exception:
                # TODO(synk): drop fallback once Buffered(1) is universally supported.
                self._single_buffer_params = False
                out = self._forward(x, False)
        else:
            out = self._forward(x, self._single_buffer_params)

        if self.single_label_mode:
            return out[:, : self.num_classes]
        result = {}
        off = 0
        for label, nc in zip(self.head_labels, self.head_sizes):
            result[label] = out[:, off:off + nc]
            off += nc
        return result

    # pure-JAX f32 reference (for correctness checking only)
    def reference(self, x):
        h = x.astype(jnp.float32)
        for w, b in self._trunk_f32:
            h = self.act(h @ w + b)
        y = h @ self._W_out_f32 + self._b_out_f32
        if self.single_label_mode:
            return y
        result = {}
        off = 0
        for label, nc in zip(self.head_labels, self.head_sizes):
            result[label] = y[:, off:off + nc]
            off += nc
        return result


if __name__ == "__main__":
    key = jax.random.PRNGKey(0)
    k_x, k_m1, k_m2, k_m3 = jax.random.split(key, 4)

    batch, input_dim, hidden_dim = 2, 16, 32
    x = jax.random.normal(k_x, (batch, input_dim), jnp.float32)

    # Case 1: multi-label mode (dict of heads), 2-layer MLP trunk, f32 compute.
    model_multi = LatentClassifier(
        input_dim, {"color": 8, "shape": 4}, num_layers=2,
        hidden_dim=hidden_dim, activation="relu", key=k_m1)
    out_multi = model_multi(x)
    jax.block_until_ready(out_multi)
    ref_multi = model_multi.reference(x)
    for label in ref_multi:
        assert out_multi[label].shape == ref_multi[label].shape, label
        assert jnp.allclose(out_multi[label], ref_multi[label], atol=1e-5), label

    # Case 2: single-label mode, single Linear layer, f32 compute.
    model_single = LatentClassifier(input_dim, 10, num_layers=1, key=k_m2)
    out_single = model_single(x)
    jax.block_until_ready(out_single)
    ref_single = model_single.reference(x)
    assert out_single.shape == (batch, 10)
    assert jnp.allclose(out_single, ref_single, atol=1e-5)

    # Case 3: bf16 matmul operands (valid on v5e/v6e/v7x MXU), f32 accumulate — loose check.
    model_bf16 = LatentClassifier(
        input_dim, {"color": 8, "shape": 4}, num_layers=3,
        hidden_dim=hidden_dim, activation="tanh", key=k_m3,
        compute_dtype=jnp.bfloat16)
    out_bf16 = model_bf16(x)
    jax.block_until_ready(out_bf16)
    ref_bf16 = model_bf16.reference(x)
    for label in ref_bf16:
        assert out_bf16[label].shape == ref_bf16[label].shape, label
        assert jnp.allclose(out_bf16[label], ref_bf16[label], atol=0.3), label

    print("KERNEL_OK")
</pallas_src>

<mosaic_0001>
module attributes {stable_mosaic.version = 11 : i64} {
  func.func @kernel(%arg0: i32, %arg1: memref<8x16xf32, #tpu.memory_space<vmem>>, %arg2: memref<16x32xf32, #tpu.memory_space<vmem>>, %arg3: memref<1x32xf32, #tpu.memory_space<vmem>>, %arg4: memref<32x128xf32, #tpu.memory_space<vmem>>, %arg5: memref<1x128xf32, #tpu.memory_space<vmem>>, %arg6: memref<8x128xf32, #tpu.memory_space<vmem>>) attributes {dimension_semantics = [#tpu.dimension_semantics<parallel>], iteration_bounds = array<i64: 1>, scalar_prefetch = 0 : i64, scratch_operands = 0 : i64, tpu.core_type = #tpu.core_type<tc>, window_params = [{transform_indices = @transform_0, window_bounds = array<i64: 8, 16>}, {pipeline_mode = #tpu.pipeline_mode<synchronous>, transform_indices = @transform_1, window_bounds = array<i64: 16, 32>}, {pipeline_mode = #tpu.pipeline_mode<synchronous>, transform_indices = @transform_2, window_bounds = array<i64: 1, 32>}, {pipeline_mode = #tpu.pipeline_mode<synchronous>, transform_indices = @transform_3, window_bounds = array<i64: 32, 128>}, {pipeline_mode = #tpu.pipeline_mode<synchronous>, transform_indices = @transform_4, window_bounds = array<i64: 1, 128>}, {transform_indices = @transform_5, window_bounds = array<i64: 8, 128>}]} {
    %c0 = arith.constant 0 : index
    %c0_0 = arith.constant 0 : index
    %0 = vector.load %arg1[%c0, %c0_0] : memref<8x16xf32, #tpu.memory_space<vmem>>, vector<8x16xf32>
    %c0_1 = arith.constant 0 : index
    %c0_2 = arith.constant 0 : index
    %1 = vector.load %arg2[%c0_1, %c0_2] : memref<16x32xf32, #tpu.memory_space<vmem>>, vector<16x32xf32>
    %c0_3 = arith.constant 0 : index
    %c0_4 = arith.constant 0 : index
    %2 = vector.load %arg3[%c0_3, %c0_4] : memref<1x32xf32, #tpu.memory_space<vmem>>, vector<1x32xf32>
    %cst = arith.constant dense<0.000000e+00> : vector<8x32xf32>
    %3 = tpu.matmul %0, %1, %cst {dimension_numbers = #tpu.dot_dimension_numbers<[1], [0], [0], [1], [0, 0, 1, 1], [], []>} : vector<8x16xf32>, vector<16x32xf32>, vector<8x32xf32> -> vector<8x32xf32>
    %4 = vector.broadcast %2 : vector<1x32xf32> to vector<8x32xf32>
    %5 = arith.addf %3, %4 : vector<8x32xf32>
    %cst_5 = arith.constant 0.000000e+00 : f32
    %6 = vector.broadcast %cst_5 : f32 to vector<8x32xf32>
    %7 = arith.maximumf %5, %6 : vector<8x32xf32>
    %c0_6 = arith.constant 0 : index
    %c0_7 = arith.constant 0 : index
    %8 = vector.load %arg4[%c0_6, %c0_7] : memref<32x128xf32, #tpu.memory_space<vmem>>, vector<32x128xf32>
    %c0_8 = arith.constant 0 : index
    %c0_9 = arith.constant 0 : index
    %9 = vector.load %arg5[%c0_8, %c0_9] : memref<1x128xf32, #tpu.memory_space<vmem>>, vector<1x128xf32>
    %cst_10 = arith.constant dense<0.000000e+00> : vector<8x128xf32>
    %10 = tpu.matmul %7, %8, %cst_10 {dimension_numbers = #tpu.dot_dimension_numbers<[1], [0], [0], [1], [0, 0, 1, 1], [], []>} : vector<8x32xf32>, vector<32x128xf32>, vector<8x128xf32> -> vector<8x128xf32>
    %11 = vector.broadcast %9 : vector<1x128xf32> to vector<8x128xf32>
    %12 = arith.addf %10, %11 : vector<8x128xf32>
    %c0_11 = arith.constant 0 : index
    %c0_12 = arith.constant 0 : index
    %13 = vector.load %arg6[%c0_11, %c0_12] : memref<8x128xf32, #tpu.memory_space<vmem>>, vector<8x128xf32>
    tpu.vector_store %arg6[%c0_11, %c0_12], %12 {strides = array<i32>} : memref<8x128xf32, #tpu.memory_space<vmem>>, vector<8x128xf32>,
    return
  }
  func.func @transform_0(%arg0: i32) -> (i32, i32) {
    %c0_i32 = arith.constant 0 : i32
    %c0_i32_0 = arith.constant 0 : i32
    return %arg0, %c0_i32 : i32, i32
  }
  func.func @transform_1(%arg0: i32) -> (i32, i32) {
    %c0_i32 = arith.constant 0 : i32
    %c0_i32_0 = arith.constant 0 : i32
    %c0_i32_1 = arith.constant 0 : i32
    return %c0_i32, %c0_i32_0 : i32, i32
  }
  func.func @transform_2(%arg0: i32) -> (i32, i32) {
    %c0_i32 = arith.constant 0 : i32
    %c0_i32_0 = arith.constant 0 : i32
    %c0_i32_1 = arith.constant 0 : i32
    return %c0_i32, %c0_i32_0 : i32, i32
  }
  func.func @transform_3(%arg0: i32) -> (i32, i32) {
    %c0_i32 = arith.constant 0 : i32
    %c0_i32_0 = arith.constant 0 : i32
    %c0_i32_1 = arith.constant 0 : i32
    return %c0_i32, %c0_i32_0 : i32, i32
  }
  func.func @transform_4(%arg0: i32) -> (i32, i32) {
    %c0_i32 = arith.constant 0 : i32
    %c0_i32_0 = arith.constant 0 : i32
    %c0_i32_1 = arith.constant 0 : i32
    return %c0_i32, %c0_i32_0 : i32, i32
  }
  func.func @transform_5(%arg0: i32) -> (i32, i32) {
    %c0_i32 = arith.constant 0 : i32
    %c0_i32_0 = arith.constant 0 : i32
    return %arg0, %c0_i32 : i32, i32
  }
}

module attributes {stable_mosaic.version = 11 : i64} {
  func.func @kernel(%arg0: i32, %arg1: memref<8x16xf32, #tpu.memory_space<vmem>>, %arg2: memref<16x32xf32, #tpu.memory_space<vmem>>, %arg3: memref<1x32xf32, #tpu.memory_space<vmem>>, %arg4: memref<32x128xf32, #tpu.memory_space<vmem>>, %arg5: memref<1x128xf32, #tpu.memory_space<vmem>>, %arg6: memref<8x128xf32, #tpu.memory_space<vmem>>) attributes {dimension_semantics = [#tpu.dimension_semantics<parallel>], iteration_bounds = array<i64: 1>, scalar_prefetch = 0 : i64, scratch_operands = 0 : i64, tpu.core_type = #tpu.core_type<tc>, window_params = [{transform_indices = @transform_0, window_bounds = array<i64: 8, 16>}, {pipeline_mode = #tpu.pipeline_mode<synchronous>, transform_indices = @transform_1, window_bounds = array<i64: 16, 32>}, {pipeline_mode = #tpu.pipeline_mode<synchronous>, transform_indices = @transform_2, window_bounds = array<i64: 1, 32>}, {pipeline_mode = #tpu.pipeline_mode<synchronous>, transform_indices = @transform_3, window_bounds = array<i64: 32, 128>}, {pipeline_mode = #tpu.pipeline_mode<synchronous>, transform_indices = @transform_4, window_bounds = array<i64: 1, 128>}, {transform_indices = @transform_5, window_bounds = array<i64: 8, 128>}]} {
    %c0 = arith.constant 0 : index
    %c0_0 = arith.constant 0 : index
    %0 = vector.load %arg1[%c0, %c0_0] : memref<8x16xf32, #tpu.memory_space<vmem>>, vector<8x16xf32>
    %c0_1 = arith.constant 0 : index
    %c0_2 = arith.constant 0 : index
    %1 = vector.load %arg2[%c0_1, %c0_2] : memref<16x32xf32, #tpu.memory_space<vmem>>, vector<16x32xf32>
    %c0_3 = arith.constant 0 : index
    %c0_4 = arith.constant 0 : index
    %2 = vector.load %arg3[%c0_3, %c0_4] : memref<1x32xf32, #tpu.memory_space<vmem>>, vector<1x32xf32>
    %cst = arith.constant dense<0.000000e+00> : vector<8x32xf32>
    %3 = tpu.matmul %0, %1, %cst {dimension_numbers = #tpu.dot_dimension_numbers<[1], [0], [0], [1], [0, 0, 1, 1], [], []>} : vector<8x16xf32>, vector<16x32xf32>, vector<8x32xf32> -> vector<8x32xf32>
    %4 = vector.broadcast %2 : vector<1x32xf32> to vector<8x32xf32>
    %5 = arith.addf %3, %4 : vector<8x32xf32>
    %cst_5 = arith.constant 0.000000e+00 : f32
    %6 = vector.broadcast %cst_5 : f32 to vector<8x32xf32>
    %7 = arith.maximumf %5, %6 : vector<8x32xf32>
    %c0_6 = arith.constant 0 : index
    %c0_7 = arith.constant 0 : index
    %8 = vector.load %arg4[%c0_6, %c0_7] : memref<32x128xf32, #tpu.memory_space<vmem>>, vector<32x128xf32>
    %c0_8 = arith.constant 0 : index
    %c0_9 = arith.constant 0 : index
    %9 = vector.load %arg5[%c0_8, %c0_9] : memref<1x128xf32, #tpu.memory_space<vmem>>, vector<1x128xf32>
    %cst_10 = arith.constant dense<0.000000e+00> : vector<8x128xf32>
    %10 = tpu.matmul %7, %8, %cst_10 {dimension_numbers = #tpu.dot_dimension_numbers<[1], [0], [0], [1], [0, 0, 1, 1], [], []>} : vector<8x32xf32>, vector<32x128xf32>, vector<8x128xf32> -> vector<8x128xf32>
    %11 = vector.broadcast %9 : vector<1x128xf32> to vector<8x128xf32>
    %12 = arith.addf %10, %11 : vector<8x128xf32>
    %c0_11 = arith.constant 0 : index
    %c0_12 = arith.constant 0 : index
    %13 = vector.load %arg6[%c0_11, %c0_12] : memref<8x128xf32, #tpu.memory_space<vmem>>, vector<8x128xf32>
    tpu.vector_store %arg6[%c0_11, %c0_12], %12 {strides = array<i32>} : memref<8x128xf32, #tpu.memory_space<vmem>>, vector<8x128xf32>,
    return
  }
  func.func @transform_0(%arg0: i32) -> (i32, i32) {
    %c0_i32 = arith.constant 0 : i32
    %c0_i32_0 = arith.constant 0 : i32
    return %arg0, %c0_i32 : i32, i32
  }
  func.func @transform_1(%arg0: i32) -> (i32, i32) {
    %c0_i32 = arith.constant 0 : i32
    %c0_i32_0 = arith.constant 0 : i32
    %c0_i32_1 = arith.constant 0 : i32
    return %c0_i32, %c0_i32_0 : i32, i32
  }
  func.func @transform_2(%arg0: i32) -> (i32, i32) {
    %c0_i32 = arith.constant 0 : i32
    %c0_i32_0 = arith.constant 0 : i32
    %c0_i32_1 = arith.constant 0 : i32
    return %c0_i32, %c0_i32_0 : i32, i32
  }
  func.func @transform_3(%arg0: i32) -> (i32, i32) {
    %c0_i32 = arith.constant 0 : i32
    %c0_i32_0 = arith.constant 0 : i32
    %c0_i32_1 = arith.constant 0 : i32
    return %c0_i32, %c0_i32_0 : i32, i32
  }
  func.func @transform_4(%arg0: i32) -> (i32, i32) {
    %c0_i32 = arith.constant 0 : i32
    %c0_i32_0 = arith.constant 0 : i32
    %c0_i32_1 = arith.constant 0 : i32
    return %c0_i32, %c0_i32_0 : i32, i32
  }
  func.func @transform_5(%arg0: i32) -> (i32, i32) {
    %c0_i32 = arith.constant 0 : i32
    %c0_i32_0 = arith.constant 0 : i32
    return %arg0, %c0_i32 : i32, i32
  }
}

</mosaic_0001>

<bundles_post_ra>
// kernel: tpu_custom_call.1
= control target key start
LH: loop header
LB: loop body
LE: loop exit
PB: predicated region body
PF: predicated region fallthrough
CT: control target
= control target key end

     0   :  { %10 = vsyncpa [#allocation3], 0  ;;  %s502_s0 = inlined_call_operand.hbm [shape: f32[2,16], index: 0, kind: input, shape index: {}]   ;;  %s503_s1 = inlined_call_operand.hbm [shape: f32[16,32], index: 1, kind: input, shape index: {}]   ;;  %s504_s2 = inlined_call_operand.vmem [shape: f32[1,32], index: 2, kind: input, shape index: {}]   ;;  %s505_s3 = inlined_call_operand.hbm [shape: f32[32,128], index: 3, kind: input, shape index: {}]   ;;  %s506_s4 = inlined_call_operand.vmem [shape: f32[1,128], index: 4, kind: input, shape index: {}]   ;;  %s507_s5 = inlined_call_operand.hbm [shape: f32[2,128], index: 5, kind: output, shape index: {}]  }
   0x1   :  { %11 = vsyncpa [#allocation6], 0 }
   0x2   :  { %12 = vsyncpa [#allocation4], 0 }
   0x3   :  { %17 = vsyncadd [#allocation3], 96  ;;  %s395_s18 = smov [#allocation5]   ;;  %s301_s22 = scalar_lea.hbm %s503_s1, 256 }
   0x4   :  { %s30_s19 = sshll.u32 %s395_s18, 4  ;;  %p302_p0 = scmp.ne.s32.totalorder %s503_s1, %s301_s22  ;;  %s31_s19 = int_to_ptr.vmem [resolvable:$true] %s30_s19 }
   0x5   :  { %p305_p1 = scmp.lt.u32.totalorder %s301_s22, %s503_s1 }
   0x7   :  { %p307_p2 = pnand %p305_p1, %p302_p0 }
   0x9   :  { %310 = shalt.err (!%p307_p2)
}
   0xa   :  { %s311_s27 = scalar_lea.vmem %s31_s19, 256  ;;  %p316_p4 = scmp.lt.s32.totalorder %s31_s19, %s31_s19 }
   0xb   :  { %p312_p3 = scmp.ne.s32.totalorder %s31_s19, %s311_s27  ;;  %p317_p5 = scmp.lt.s32.totalorder %s311_s27, %s311_s27 }
   0xd   :  { %p318_p6 = por %p317_p5, %p316_p4 }
   0xf   :  { %p319_p7 = pnand %p318_p6, %p312_p3 }
  0x11   :  { %322 = shalt.err (!%p319_p7)
}
  0x12   :  { %s396_s28 = smov 128   ;;  %s397_s29 = smov 8  }
  0x13   :  { %36 = dma.hbm_to_vmem [thread:$0]  %s503_s1, 256, %s31_s19, [#allocation6], %s396_s28, %s396_s28, %s397_s29  }
  0x14   :  { %s398_s7 = smov [#allocation2]   ;;  %s323_s11 = scalar_lea.hbm %s502_s0, 32 }
  0x15   :  { %s18_s8 = sshll.u32 %s398_s7, 4  ;;  %p324_p8 = scmp.ne.s32.totalorder %s502_s0, %s323_s11  ;;  %s19_s8 = int_to_ptr.vmem [resolvable:$true] %s18_s8 }
  0x16   :  { %p327_p9 = scmp.lt.u32.totalorder %s323_s11, %s502_s0 }
  0x18   :  { %p329_p10 = pnand %p327_p9, %p324_p8 }
  0x1a   :  { %332 = shalt.err (!%p329_p10)
}
  0x1b   :  { %s333_s16 = scalar_lea.vmem %s19_s8, 32  ;;  %s337_s1 = scalar_lea.vmem %s19_s8, 128 }
  0x1c   :  { %p334_p11 = scmp.ne.s32.totalorder %s19_s8, %s333_s16  ;;  %p338_p12 = scmp.lt.s32.totalorder %s19_s8, %s19_s8 }
  0x1d   :  { %p339_p13 = scmp.lt.s32.totalorder %s337_s1, %s333_s16 }
  0x1f   :  { %p340_p0 = por %p339_p13, %p338_p12 }
  0x21   :  { %p341_p1 = pnand %p340_p0, %p334_p11 }
  0x23   :  { %344 = shalt.err (!%p341_p1)
}
  0x24   :  { %s399_s17 = smov 32   ;;  %s400_s18 = smov 2  }
  0x25   :  { %24 = dma.hbm_to_vmem [thread:$0]  %s502_s0, 32, %s19_s8, [#allocation3], %s399_s17, %s399_s17, %s400_s18  }
  0x26   :  { %s401_s21 = smov [#allocation7]   ;;  %s345_s25 = scalar_lea.hbm %s505_s3, 512 }
  0x27   :  { %s44_s22 = sshll.u32 %s401_s21, 4  ;;  %p346_p2 = scmp.ne.s32.totalorder %s505_s3, %s345_s25  ;;  %s45_s22 = int_to_ptr.vmem [resolvable:$true] %s44_s22 }
  0x28   :  { %p349_p3 = scmp.lt.u32.totalorder %s345_s25, %s505_s3 }
  0x2a   :  { %p351_p4 = pnand %p349_p3, %p346_p2 }
  0x2c   :  { %354 = shalt.err (!%p351_p4)
}
  0x2d   :  { %s355_s7 = scalar_lea.vmem %s45_s22, 512  ;;  %p360_p6 = scmp.lt.s32.totalorder %s45_s22, %s45_s22 }
  0x2e   :  { %p356_p5 = scmp.ne.s32.totalorder %s45_s22, %s355_s7  ;;  %p361_p7 = scmp.lt.s32.totalorder %s355_s7, %s355_s7 }
  0x30   :  { %p362_p8 = por %p361_p7, %p360_p6 }
  0x32   :  { %p363_p9 = pnand %p362_p8, %p356_p5 }
  0x34   :  { %366 = shalt.err (!%p363_p9)
}
  0x35   :  { %50 = dma.hbm_to_vmem [thread:$0]  %s505_s3, 512, %s45_s22, [#allocation6], %s396_s28, %s396_s28, %s397_s29  }
  0x36   :  { %389 = dma.done.wait [#allocation3], 128  }
  0x37   :  { %390 = vsyncadd [#allocation3], 4294967168 }
  0x38   :  { %391 = dma.done.wait [#allocation6], 768  }
  0x39   :  { %392 = vsyncadd [#allocation6], 4294966528  ;;  %v402_v0 = vmov 0.0|0.0   ;;  %vm403_vm0 = vmmov 0   ;;  %v404_v1 = vmov 0.0   ;;  %v63_v2 = vld [vmem:[#allocation5] sm:$0xff] }
  0x3a   :  { %281 = vmatprep.subr.bf16.mxu0 %v402_v0  ;;  %267 = vmatprep.mubr.msk.f32.mxu0 %vm403_vm0, %v404_v1  ;;  %v64_v3 = vld [vmem:[#allocation5 + $0x8] sm:$0xff]  ;;  %v147_v5 = vld [vmem:[#allocation7] sm:$0xff]  ;;  %v148_v6 = vld [vmem:[#allocation7 + $0x8] sm:$0xff]  ;;  %vm72_vm1 = vcmask 130048   ;;  %vm158_vm2 = vcmask 261120  }
  0x3b   :  { %284 = vmatprep.subr.bf16.mxu1 %v402_v0  ;;  %278 = vmatprep.mubr.msk.f32.mxu1 %vm403_vm0, %v404_v1  ;;  %v282_v4 = vpack.c.bf16 %v64_v3, %v63_v2  ;;  %v285_v7 = vpack.c.bf16 %v148_v6, %v147_v5  ;;  %v62_v8 = vld [vmem:[#allocation2] sm:$0xff]  ;;  %v149_v9 = vld [vmem:[#allocation7 + $0x10] sm:$0xff]  ;;  %v150_v10 = vld [vmem:[#allocation7 + $0x18] sm:$0xff] }
  0x3c   :  { %v288_v11 = vpack.c.bf16 %v150_v10, %v149_v9  ;;  %v251_v12 = vld [vmem:[%s504_s2] ss:$0 sm:$0xff] }
  0x3d   :  { %283 = vmatpush3.bf16.msra.mxu0 %v282_v4  ;;  %286 = vmatpush3.bf16.msra.mxu1 %v285_v7  ;;  %v253_v17 = vld [vmem:[%s506_s4] ss:$0 sm:$0xff] }
  0x3e   :  { %287 = vmatprep.subr.bf16.mxu1 %v402_v0 }
  0x40   :  { %268 = vmatmul.mubr.msk.f32.vlgmr.msra.gmra.mrb[0].mxu0 %vm72_vm1, %v62_v8 }
  0x41   :  { %289 = vmatpush3.bf16.msra.mxu1 %v288_v11 }
 0x113   :  { %v142_v13 = vpop.f32.mrb[0].mxu0 }
 0x114   :  { %v143_v14 = vadd.f32 %v251_v12, %v142_v13  ;;  %v269_v15 = vpop.f32.mrb[1].mxu0 }
 0x116   :  { %v146_v16 = vmax.f32 %v143_v14, 0.0 }
 0x118   :  { %279 = vmatmul.mubr.msk.f32.vlgmr.msra.gmra.mrb[0].mxu1 %vm158_vm2, %v146_v16 }
 0x1eb   :  { %v228_v18 = vpop.f32.mrb[0].mxu1 }
 0x1ec   :  { %v229_v19 = vadd.f32 %v253_v17, %v228_v18  ;;  %v280_v20 = vpop.f32.mrb[1].mxu1 }
 0x1ee   :  { %232 = vst [vmem:[#allocation8] sm:$0xff] %v229_v19 }
 0x1ef   :  { %237 = vsyncadd [#allocation4], 96  ;;  %s405_s10 = smov [#allocation8]  }
 0x1f0   :  { %s238_s11 = sshll.u32 %s405_s10, 4  ;;  %s239_s11 = int_to_ptr.vmem [resolvable:$true] %s238_s11 }
 0x1f1   :  { %s367_s12 = scalar_lea.vmem %s239_s11, 32  ;;  %s371_s2 = scalar_lea.vmem %s239_s11, 128 }
 0x1f2   :  { %p368_p10 = scmp.ne.s32.totalorder %s239_s11, %s367_s12  ;;  %p372_p11 = scmp.lt.s32.totalorder %s239_s11, %s239_s11 }
 0x1f3   :  { %p373_p12 = scmp.lt.s32.totalorder %s371_s2, %s367_s12 }
 0x1f5   :  { %p374_p13 = por %p373_p12, %p372_p11 }
 0x1f7   :  { %p375_p0 = pnand %p374_p13, %p368_p10 }
 0x1f9   :  { %378 = shalt.err (!%p375_p0)
}
 0x1fa   :  { %s379_s4 = scalar_lea.hbm %s507_s5, 32 }
 0x1fb   :  { %p380_p1 = scmp.ne.s32.totalorder %s507_s5, %s379_s4  ;;  %p383_p2 = scmp.lt.u32.totalorder %s379_s4, %s507_s5 }
 0x1fd   :  { %p385_p3 = pnand %p383_p2, %p380_p1 }
 0x1ff   :  { %388 = shalt.err (!%p385_p3)
}
 0x200   :  { %244 = dma.vmem_to_hbm [thread:$0]  %s239_s11, 32, %s507_s5, [#allocation4], %s399_s17, %s399_s17, %s400_s18  }
 0x201   :  { %393 = dma.done.wait [#allocation4], 128  }
 0x202   :  { %394 = vsyncadd [#allocation4], 4294967168 }
 0x203   :  { %248 = vsyncpa [#allocation3], 1 }
 0x204   :  { %249 = vsyncpa [#allocation6], 1 }
 0x205   :  { %250 = vsyncpa [#allocation4], 1 }

// kernel: tpu_custom_call.1
= control target key start
LH: loop header
LB: loop body
LE: loop exit
PB: predicated region body
PF: predicated region fallthrough
CT: control target
= control target key end

     0   :  { %10 = vsyncpa [#allocation3], 0  ;;  %s502_s0 = inlined_call_operand.hbm [shape: f32[2,16], index: 0, kind: input, shape index: {}]   ;;  %s503_s1 = inlined_call_operand.hbm [shape: f32[16,32], index: 1, kind: input, shape index: {}]   ;;  %s504_s2 = inlined_call_operand.vmem [shape: f32[1,32], index: 2, kind: input, shape index: {}]   ;;  %s505_s3 = inlined_call_operand.hbm [shape: f32[32,128], index: 3, kind: input, shape index: {}]   ;;  %s506_s4 = inlined_call_operand.vmem [shape: f32[1,128], index: 4, kind: input, shape index: {}]   ;;  %s507_s5 = inlined_call_operand.hbm [shape: f32[2,128], index: 5, kind: output, shape index: {}]  }
   0x1   :  { %11 = vsyncpa [#allocation6], 0 }
   0x2   :  { %12 = vsyncpa [#allocation4], 0 }
   0x3   :  { %17 = vsyncadd [#allocation3], 96  ;;  %s395_s18 = smov [#allocation5]   ;;  %s301_s22 = scalar_lea.hbm %s503_s1, 256 }
   0x4   :  { %s30_s19 = sshll.u32 %s395_s18, 4  ;;  %p302_p0 = scmp.ne.s32.totalorder %s503_s1, %s301_s22  ;;  %s31_s19 = int_to_ptr.vmem [resolvable:$true] %s30_s19 }
   0x5   :  { %p305_p1 = scmp.lt.u32.totalorder %s301_s22, %s503_s1 }
   0x7   :  { %p307_p2 = pnand %p305_p1, %p302_p0 }
   0x9   :  { %310 = shalt.err (!%p307_p2)
}
   0xa   :  { %s311_s27 = scalar_lea.vmem %s31_s19, 256  ;;  %p316_p4 = scmp.lt.s32.totalorder %s31_s19, %s31_s19 }
   0xb   :  { %p312_p3 = scmp.ne.s32.totalorder %s31_s19, %s311_s27  ;;  %p317_p5 = scmp.lt.s32.totalorder %s311_s27, %s311_s27 }
   0xd   :  { %p318_p6 = por %p317_p5, %p316_p4 }
   0xf   :  { %p319_p7 = pnand %p318_p6, %p312_p3 }
  0x11   :  { %322 = shalt.err (!%p319_p7)
}
  0x12   :  { %s396_s28 = smov 128   ;;  %s397_s29 = smov 8  }
  0x13   :  { %36 = dma.hbm_to_vmem [thread:$0]  %s503_s1, 256, %s31_s19, [#allocation6], %s396_s28, %s396_s28, %s397_s29  }
  0x14   :  { %s398_s7 = smov [#allocation2]   ;;  %s323_s11 = scalar_lea.hbm %s502_s0, 32 }
  0x15   :  { %s18_s8 = sshll.u32 %s398_s7, 4  ;;  %p324_p8 = scmp.ne.s32.totalorder %s502_s0, %s323_s11  ;;  %s19_s8 = int_to_ptr.vmem [resolvable:$true] %s18_s8 }
  0x16   :  { %p327_p9 = scmp.lt.u32.totalorder %s323_s11, %s502_s0 }
  0x18   :  { %p329_p10 = pnand %p327_p9, %p324_p8 }
  0x1a   :  { %332 = shalt.err (!%p329_p10)
}
  0x1b   :  { %s333_s16 = scalar_lea.vmem %s19_s8, 32  ;;  %s337_s1 = scalar_lea.vmem %s19_s8, 128 }
  0x1c   :  { %p334_p11 = scmp.ne.s32.totalorder %s19_s8, %s333_s16  ;;  %p338_p12 = scmp.lt.s32.totalorder %s19_s8, %s19_s8 }
  0x1d   :  { %p339_p13 = scmp.lt.s32.totalorder %s337_s1, %s333_s16 }
  0x1f   :  { %p340_p0 = por %p339_p13, %p338_p12 }
  0x21   :  { %p341_p1 = pnand %p340_p0, %p334_p11 }
  0x23   :  { %344 = shalt.err (!%p341_p1)
}
  0x24   :  { %s399_s17 = smov 32   ;;  %s400_s18 = smov 2  }
  0x25   :  { %24 = dma.hbm_to_vmem [thread:$0]  %s502_s0, 32, %s19_s8, [#allocation3], %s399_s17, %s399_s17, %s400_s18  }
  0x26   :  { %s401_s21 = smov [#allocation7]   ;;  %s345_s25 = scalar_lea.hbm %s505_s3, 512 }
  0x27   :  { %s44_s22 = sshll.u32 %s401_s21, 4  ;;  %p346_p2 = scmp.ne.s32.totalorder %s505_s3, %s345_s25  ;;  %s45_s22 = int_to_ptr.vmem [resolvable:$true] %s44_s22 }
  0x28   :  { %p349_p3 = scmp.lt.u32.totalorder %s345_s25, %s505_s3 }
  0x2a   :  { %p351_p4 = pnand %p349_p3, %p346_p2 }
  0x2c   :  { %354 = shalt.err (!%p351_p4)
}
  0x2d   :  { %s355_s7 = scalar_lea.vmem %s45_s22, 512  ;;  %p360_p6 = scmp.lt.s32.totalorder %s45_s22, %s45_s22 }
  0x2e   :  { %p356_p5 = scmp.ne.s32.totalorder %s45_s22, %s355_s7  ;;  %p361_p7 = scmp.lt.s32.totalorder %s355_s7, %s355_s7 }
  0x30   :  { %p362_p8 = por %p361_p7, %p360_p6 }
  0x32   :  { %p363_p9 = pnand %p362_p8, %p356_p5 }
  0x34   :  { %366 = shalt.err (!%p363_p9)
}
  0x35   :  { %50 = dma.hbm_to_vmem [thread:$0]  %s505_s3, 512, %s45_s22, [#allocation6], %s396_s28, %s396_s28, %s397_s29  }
  0x36   :  { %389 = dma.done.wait [#allocation3], 128  }
  0x37   :  { %390 = vsyncadd [#allocation3], 4294967168 }
  0x38   :  { %391 = dma.done.wait [#allocation6], 768  }
  0x39   :  { %392 = vsyncadd [#allocation6], 4294966528  ;;  %v402_v0 = vmov 0.0|0.0   ;;  %vm403_vm0 = vmmov 0   ;;  %v404_v1 = vmov 0.0   ;;  %v63_v2 = vld [vmem:[#allocation5] sm:$0xff] }
  0x3a   :  { %281 = vmatprep.subr.bf16.mxu0 %v402_v0  ;;  %267 = vmatprep.mubr.msk.f32.mxu0 %vm403_vm0, %v404_v1  ;;  %v64_v3 = vld [vmem:[#allocation5 + $0x8] sm:$0xff]  ;;  %v147_v5 = vld [vmem:[#allocation7] sm:$0xff]  ;;  %v148_v6 = vld [vmem:[#allocation7 + $0x8] sm:$0xff]  ;;  %vm72_vm1 = vcmask 130048   ;;  %vm158_vm2 = vcmask 261120  }
  0x3b   :  { %284 = vmatprep.subr.bf16.mxu1 %v402_v0  ;;  %278 = vmatprep.mubr.msk.f32.mxu1 %vm403_vm0, %v404_v1  ;;  %v282_v4 = vpack.c.bf16 %v64_v3, %v63_v2  ;;  %v285_v7 = vpack.c.bf16 %v148_v6, %v147_v5  ;;  %v62_v8 = vld [vmem:[#allocation2] sm:$0xff]  ;;  %v149_v9 = vld [vmem:[#allocation7 + $0x10] sm:$0xff]  ;;  %v150_v10 = vld [vmem:[#allocation7 + $0x18] sm:$0xff] }
  0x3c   :  { %v288_v11 = vpack.c.bf16 %v150_v10, %v149_v9  ;;  %v251_v12 = vld [vmem:[%s504_s2] ss:$0 sm:$0xff] }
  0x3d   :  { %283 = vmatpush3.bf16.msra.mxu0 %v282_v4  ;;  %286 = vmatpush3.bf16.msra.mxu1 %v285_v7  ;;  %v253_v17 = vld [vmem:[%s506_s4] ss:$0 sm:$0xff] }
  0x3e   :  { %287 = vmatprep.subr.bf16.mxu1 %v402_v0 }
  0x40   :  { %268 = vmatmul.mubr.msk.f32.vlgmr.msra.gmra.mrb[0].mxu0 %vm72_vm1, %v62_v8 }
  0x41   :  { %289 = vmatpush3.bf16.msra.mxu1 %v288_v11 }
 0x113   :  { %v142_v13 = vpop.f32.mrb[0].mxu0 }
 0x114   :  { %v143_v14 = vadd.f32 %v251_v12, %v142_v13  ;;  %v269_v15 = vpop.f32.mrb[1].mxu0 }
 0x116   :  { %v146_v16 = vmax.f32 %v143_v14, 0.0 }
 0x118   :  { %279 = vmatmul.mubr.msk.f32.vlgmr.msra.gmra.mrb[0].mxu1 %vm158_vm2, %v146_v16 }
 0x1eb   :  { %v228_v18 = vpop.f32.mrb[0].mxu1 }
 0x1ec   :  { %v229_v19 = vadd.f32 %v253_v17, %v228_v18  ;;  %v280_v20 = vpop.f32.mrb[1].mxu1 }
 0x1ee   :  { %232 = vst [vmem:[#allocation8] sm:$0xff] %v229_v19 }
 0x1ef   :  { %237 = vsyncadd [#allocation4], 96  ;;  %s405_s10 = smov [#allocation8]  }
 0x1f0   :  { %s238_s11 = sshll.u32 %s405_s10, 4  ;;  %s239_s11 = int_to_ptr.vmem [resolvable:$true] %s238_s11 }
 0x1f1   :  { %s367_s12 = scalar_lea.vmem %s239_s11, 32  ;;  %s371_s2 = scalar_lea.vmem %s239_s11, 128 }
 0x1f2   :  { %p368_p10 = scmp.ne.s32.totalorder %s239_s11, %s367_s12  ;;  %p372_p11 = scmp.lt.s32.totalorder %s239_s11, %s239_s11 }
 0x1f3   :  { %p373_p12 = scmp.lt.s32.totalorder %s371_s2, %s367_s12 }
 0x1f5   :  { %p374_p13 = por %p373_p12, %p372_p11 }
 0x1f7   :  { %p375_p0 = pnand %p374_p13, %p368_p10 }
 0x1f9   :  { %378 = shalt.err (!%p375_p0)
}
 0x1fa   :  { %s379_s4 = scalar_lea.hbm %s507_s5, 32 }
 0x1fb   :  { %p380_p1 = scmp.ne.s32.totalorder %s507_s5, %s379_s4  ;;  %p383_p2 = scmp.lt.u32.totalorder %s379_s4, %s507_s5 }
 0x1fd   :  { %p385_p3 = pnand %p383_p2, %p380_p1 }
 0x1ff   :  { %388 = shalt.err (!%p385_p3)
}
 0x200   :  { %244 = dma.vmem_to_hbm [thread:$0]  %s239_s11, 32, %s507_s5, [#allocation4], %s399_s17, %s399_s17, %s400_s18  }
 0x201   :  { %393 = dma.done.wait [#allocation4], 128  }
 0x202   :  { %394 = vsyncadd [#allocation4], 4294967168 }
 0x203   :  { %248 = vsyncpa [#allocation3], 1 }
 0x204   :  { %249 = vsyncpa [#allocation6], 1 }
 0x205   :  { %250 = vsyncpa [#allocation4], 1 }

</bundles_post_ra>
